<compile_context>
chip_gen: v5e
topology: v5e:2x2
jax: 0.10.0
libtpu: 0.0.40
codegen_flags: <defaults>
</compile_context>

<pallas_src>
import functools

import jax
import jax.numpy as jnp
from jax.experimental import pallas as pl
from jax.experimental.pallas import tpu as pltpu


def _round_up(x, m):
    return ((x + m - 1) // m) * m


@functools.lru_cache(maxsize=1)
def _tpu_params():
    """(vmem_capacity_bytes, lane_align, num_tensorcores) with safe fallbacks."""
    vmem_cap = 64 * 2**20      # conservative default (v7x per-TC VMEM)
    lane_align = 128           # safe on every generation
    num_cores = 1
    try:
        info = pltpu.get_tpu_info()
        vmem_cap = int(getattr(info, "vmem_capacity_bytes", vmem_cap))
    except Exception:
        pass
    try:
        kind = jax.devices()[0].device_kind.lower()
        if "v5" in kind:
            lane_align, num_cores = 128, 1          # 4x128^2 MXU, 1 TC
        else:
            lane_align = 256                        # v6e / v7x MXU is 2x256^2
            num_cores = 2 if "7" in kind else 1     # v7x: 2 TCs per chip
    except Exception:
        pass
    return vmem_cap, lane_align, num_cores


def _footprint_bytes(tm, tff, n_pad, x_isz, w_isz, o_isz):
    """Double-buffered VMEM footprint of one (tm, tff) grid step."""
    return (2 * tm * n_pad * x_isz        # x tile (double-buffered)
            + 2 * tm * n_pad * o_isz      # out tile (double-buffered)
            + 4 * tm * n_pad              # f32 accumulator scratch
            + 4 * tm * tff                # f32 fc1 intermediate
            + 2 * n_pad * tff * w_isz     # W1 tile (double-buffered)
            + 2 * tff * n_pad * w_isz     # W2 tile (double-buffered)
            + 2 * (tff + n_pad) * 4)      # biases (upper bound)


def _select_tiles(M, n_pad, ff_pad, x_isz, w_isz, o_isz, sublane, lane_align,
                  vmem_budget, num_cores):
    """Pick (tm, tff): maximize tm (weight reuse) then tff (fewer k steps)."""
    # ff tile candidates: lane-aligned divisors of ff_pad (no overshoot).
    tff_cands = [d for d in range(lane_align, min(ff_pad, 2048) + 1, lane_align)
                 if ff_pad % d == 0]
    if not tff_cands:
        tff_cands = [ff_pad]
    tff_cands = sorted(set(tff_cands), reverse=True)
    tff_min = tff_cands[-1]

    # Useful upper bound on the row tile; keep >= num_cores row tiles so both
    # TensorCores get work on v7x-class parts.
    tm_limit = _round_up(max(M, 1), sublane)
    if num_cores > 1 and M > sublane:
        tm_limit = max(sublane, _round_up(-(-M // num_cores), sublane))
    tm_limit = min(tm_limit, 2048)

    tm_cands = [t for t in (2048, 1536, 1024, 768, 512, 384, 256, 128, 64, 32, 16, 8)
                if t % sublane == 0 and t <= tm_limit]
    if not tm_cands:
        tm_cands = [_round_up(tm_limit, sublane)]

    for tm in tm_cands:
        if _footprint_bytes(tm, tff_min, n_pad, x_isz, w_isz, o_isz) <= vmem_budget:
            for tff in tff_cands:
                if _footprint_bytes(tm, tff, n_pad, x_isz, w_isz, o_isz) <= vmem_budget:
                    return tm, tff
            return tm, tff_min
    return tm_cands[-1], tff_min   # may exceed the budget; let Mosaic try


def _pad_to(a, shape):
    pads = tuple((0, t - s) for s, t in zip(a.shape, shape))
    if all(p == (0, 0) for p in pads):
        return a            # already aligned: no extra HBM pass over the array
    return jnp.pad(a, pads)


def _ffn_kernel(x_ref, w1_ref, b1_ref, w2_ref, b2_ref, o_ref, acc_ref):
    """One (row-tile, ff-tile) step of  o = silu(x @ W1 + b1) @ W2 + b2."""
    k = pl.program_id(1)

    @pl.when(k == 0)
    def _():
        acc_ref[...] = jnp.zeros_like(acc_ref)

    # fc1 partial columns for this ff tile: (tm, tff). Native-dtype operands,
    # f32 accumulation on the MXU.
    h = jnp.dot(x_ref[...], w1_ref[...], preferred_element_type=jnp.float32)
    h = h + b1_ref[...].astype(jnp.float32)
    h = h * jax.nn.sigmoid(h)          # SiLU: sigmoid -> EUP, mul -> VPU

    # fc2 partial reduction over this ff tile into the resident f32 accumulator.
    acc_ref[...] += jnp.dot(h.astype(w2_ref.dtype), w2_ref[...],
                            preferred_element_type=jnp.float32)

    # Bias add + downcast + lane-dense store only once, on the last k step.
    @pl.when(k == pl.num_programs(1) - 1)
    def _():
        o_ref[...] = (acc_ref[...]
                      + b2_ref[...].astype(jnp.float32)).astype(o_ref.dtype)


@jax.jit
def feed_forward(x, w1, b1, w2, b2):
    """x: (..., n_embd). Weights stored (in, out): w1 (n_embd, ff_dim), w2 (ff_dim, n_embd)."""
    orig_shape = x.shape
    n_embd = orig_shape[-1]
    ff_dim = w1.shape[1]

    x2d = x.reshape(-1, n_embd)
    M = x2d.shape[0]

    vmem_cap, lane_align, num_cores = _tpu_params()
    vmem_budget = int(0.85 * vmem_cap)       # headroom for compiler scratch

    x_isz = jnp.dtype(x.dtype).itemsize
    w_isz = jnp.dtype(w1.dtype).itemsize
    o_isz = x_isz
    sublane = max(8, 32 // x_isz)            # 8 f32 / 16 bf16 / 32 int8-fp8

    n_pad = _round_up(n_embd, lane_align)
    ff_pad = _round_up(ff_dim, lane_align)

    tm, tff = _select_tiles(M, n_pad, ff_pad, x_isz, w_isz, o_isz,
                            sublane, lane_align, vmem_budget, num_cores)
    M_pad = _round_up(max(M, 1), tm)
    n_row_tiles = M_pad // tm
    n_ff_tiles = ff_pad // tff

    # ---- zero padding (semantics preserving; skipped when already aligned) ----
    x_p = _pad_to(x2d, (M_pad, n_pad))
    w1_p = _pad_to(w1, (n_pad, ff_pad))
    b1_p = _pad_to(b1, (ff_pad,)).reshape(1, ff_pad)
    w2_p = _pad_to(w2, (ff_pad, n_pad))
    b2_p = _pad_to(b2, (n_pad,)).reshape(1, n_pad)

    footprint = _footprint_bytes(tm, tff, n_pad, x_isz, w_isz, o_isz)
    vmem_limit = min(vmem_budget, max(32 * 2**20, footprint + (4 << 20)))
    vmem_limit = int(min(max(vmem_limit, footprint + (2 << 20)), vmem_cap))

    cost = pl.CostEstimate(
        flops=4 * M_pad * n_pad * ff_pad,            # two matmuls
        transcendentals=M_pad * ff_pad,              # sigmoid
        bytes_accessed=int(
            x_isz * M_pad * n_pad                    # x read
            + o_isz * M_pad * n_pad                  # out write
            + w_isz * 2 * n_pad * ff_pad * n_row_tiles   # W1 + W2 re-streamed per row tile
            + 4 * (ff_pad + n_pad)),                 # biases
    )

    out = pl.pallas_call(
        _ffn_kernel,
        out_shape=jax.ShapeDtypeStruct((M_pad, n_pad), x.dtype),
        grid_spec=pltpu.PrefetchScalarGridSpec(
            num_scalar_prefetch=0,
            grid=(n_row_tiles, n_ff_tiles),
            in_specs=[
                # activations: row tile, resident across the ff reduction
                pl.BlockSpec((tm, n_pad), lambda i, k: (i, 0)),
                # W1 column tile / b1 tile stream over k
                pl.BlockSpec((n_pad, tff), lambda i, k: (0, k)),
                pl.BlockSpec((1, tff), lambda i, k: (0, k)),
                # W2 row tile streams over k
                pl.BlockSpec((tff, n_pad), lambda i, k: (k, 0)),
                # b2 fully resident
                pl.BlockSpec((1, n_pad), lambda i, k: (0, 0)),
            ],
            out_specs=pl.BlockSpec((tm, n_pad), lambda i, k: (i, 0)),
            scratch_shapes=[pltpu.VMEM((tm, n_pad), jnp.float32)],
        ),
        compiler_params=pltpu.CompilerParams(
            dimension_semantics=("parallel", "arbitrary"),
            vmem_limit_bytes=vmem_limit,
        ),
        cost_estimate=cost,
    )(x_p, w1_p, b1_p, w2_p, b2_p)

    return out[:M, :n_embd].reshape(orig_shape)


def _reference(x, w1, b1, w2, b2):
    h = x @ w1 + b1
    h = h * jax.nn.sigmoid(h)
    return h @ w2 + b2


if __name__ == "__main__":
    # Small shapes consistent with the module: (batch, seq, n_embd) tokens,
    # hidden ff_dim.  (Padded to MXU-friendly tiles inside the wrapper.)
    batch, seq, n_embd, ff_dim = 2, 8, 32, 64

    key = jax.random.PRNGKey(0)
    kx, kw1, kb1, kw2, kb2 = jax.random.split(key, 5)

    x = jax.random.normal(kx, (batch, seq, n_embd), dtype=jnp.float32)

    # PyTorch nn.Linear stores weight as (out, in) and computes x @ W.T;
    # here we directly store the transposed (in, out) matrices.
    w1 = jax.random.normal(kw1, (n_embd, ff_dim), dtype=jnp.float32) * 0.05
    b1 = jax.random.normal(kb1, (ff_dim,), dtype=jnp.float32) * 0.01
    w2 = jax.random.normal(kw2, (ff_dim, n_embd), dtype=jnp.float32) * 0.05
    b2 = jax.random.normal(kb2, (n_embd,), dtype=jnp.float32) * 0.01

    out = feed_forward(x, w1, b1, w2, b2)
    out = jax.block_until_ready(out)

    ref = _reference(x, w1, b1, w2, b2)
    assert out.shape == x.shape
    assert jnp.allclose(out, ref, atol=1e-4, rtol=1e-4), "mismatch vs reference"

    print("KERNEL_OK")
</pallas_src>

<mosaic_0001>
module attributes {stable_mosaic.version = 11 : i64} {
  func.func @_ffn_kernel(%arg0: i32, %arg1: i32, %arg2: memref<16x256xf32, #tpu.memory_space<vmem>>, %arg3: memref<256x256xf32, #tpu.memory_space<vmem>>, %arg4: memref<1x256xf32, #tpu.memory_space<vmem>>, %arg5: memref<256x256xf32, #tpu.memory_space<vmem>>, %arg6: memref<1x256xf32, #tpu.memory_space<vmem>>, %arg7: memref<16x256xf32, #tpu.memory_space<vmem>>, %arg8: memref<16x256xf32, #tpu.memory_space<vmem>>) attributes {dimension_semantics = [#tpu.dimension_semantics<parallel>, #tpu.dimension_semantics<arbitrary>], iteration_bounds = array<i64: 1, 1>, scalar_prefetch = 0 : i64, scratch_operands = 1 : i64, tpu.core_type = #tpu.core_type<tc>, window_params = [{transform_indices = @transform_0, window_bounds = array<i64: 16, 256>}, {transform_indices = @transform_1, window_bounds = array<i64: 256, 256>}, {transform_indices = @transform_2, window_bounds = array<i64: 1, 256>}, {transform_indices = @transform_3, window_bounds = array<i64: 256, 256>}, {pipeline_mode = #tpu.pipeline_mode<synchronous>, transform_indices = @transform_4, window_bounds = array<i64: 1, 256>}, {transform_indices = @transform_5, window_bounds = array<i64: 16, 256>}]} {
    %c0_i32 = arith.constant 0 : i32
    %0 = arith.cmpi eq, %arg1, %c0_i32 : i32
    %1 = arith.extui %0 : i1 to i32
    %c0_i32_0 = arith.constant 0 : i32
    %2 = arith.cmpi ne, %1, %c0_i32_0 : i32
    scf.if %2 {
      %cst_16 = arith.constant 0.000000e+00 : f32
      %23 = vector.broadcast %cst_16 : f32 to vector<16x256xf32>
      %c0_17 = arith.constant 0 : index
      %c0_18 = arith.constant 0 : index
      %24 = vector.load %arg8[%c0_17, %c0_18] : memref<16x256xf32, #tpu.memory_space<vmem>>, vector<16x256xf32>
      tpu.vector_store %arg8[%c0_17, %c0_18], %23 {strides = array<i32>} : memref<16x256xf32, #tpu.memory_space<vmem>>, vector<16x256xf32>,
    } else {
    }
    %c0 = arith.constant 0 : index
    %c0_1 = arith.constant 0 : index
    %3 = vector.load %arg2[%c0, %c0_1] : memref<16x256xf32, #tpu.memory_space<vmem>>, vector<16x256xf32>
    %c0_2 = arith.constant 0 : index
    %c0_3 = arith.constant 0 : index
    %4 = vector.load %arg3[%c0_2, %c0_3] : memref<256x256xf32, #tpu.memory_space<vmem>>, vector<256x256xf32>
    %cst = arith.constant dense<0.000000e+00> : vector<16x256xf32>
    %5 = tpu.matmul %3, %4, %cst {dimension_numbers = #tpu.dot_dimension_numbers<[1], [0], [0], [1], [0, 0, 1, 1], [], []>} : vector<16x256xf32>, vector<256x256xf32>, vector<16x256xf32> -> vector<16x256xf32>
    %c0_4 = arith.constant 0 : index
    %c0_5 = arith.constant 0 : index
    %6 = vector.load %arg4[%c0_4, %c0_5] : memref<1x256xf32, #tpu.memory_space<vmem>>, vector<1x256xf32>
    %7 = vector.broadcast %6 : vector<1x256xf32> to vector<16x256xf32>
    %8 = arith.addf %5, %7 : vector<16x256xf32>
    %9 = arith.negf %8 : vector<16x256xf32>
    %10 = math.exp %9 : vector<16x256xf32>
    %cst_6 = arith.constant 1.000000e+00 : f32
    %11 = vector.broadcast %cst_6 : f32 to vector<16x256xf32>
    %12 = arith.addf %11, %10 : vector<16x256xf32>
    %13 = arith.divf %11, %12 : vector<16x256xf32>
    %14 = arith.mulf %8, %13 : vector<16x256xf32>
    %c0_7 = arith.constant 0 : index
    %c0_8 = arith.constant 0 : index
    %15 = vector.load %arg8[%c0_7, %c0_8] : memref<16x256xf32, #tpu.memory_space<vmem>>, vector<16x256xf32>
    %c0_9 = arith.constant 0 : index
    %c0_10 = arith.constant 0 : index
    %16 = vector.load %arg5[%c0_9, %c0_10] : memref<256x256xf32, #tpu.memory_space<vmem>>, vector<256x256xf32>
    %cst_11 = arith.constant dense<0.000000e+00> : vector<16x256xf32>
    %17 = tpu.matmul %14, %16, %cst_11 {dimension_numbers = #tpu.dot_dimension_numbers<[1], [0], [0], [1], [0, 0, 1, 1], [], []>} : vector<16x256xf32>, vector<256x256xf32>, vector<16x256xf32> -> vector<16x256xf32>
    %18 = arith.addf %15, %17 : vector<16x256xf32>
    %c0_12 = arith.constant 0 : index
    %c0_13 = arith.constant 0 : index
    %19 = vector.load %arg8[%c0_12, %c0_13] : memref<16x256xf32, #tpu.memory_space<vmem>>, vector<16x256xf32>
    tpu.vector_store %arg8[%c0_12, %c0_13], %18 {strides = array<i32>} : memref<16x256xf32, #tpu.memory_space<vmem>>, vector<16x256xf32>,
    %c0_i32_14 = arith.constant 0 : i32
    %20 = arith.cmpi eq, %arg1, %c0_i32_14 : i32
    %21 = arith.extui %20 : i1 to i32
    %c0_i32_15 = arith.constant 0 : i32
    %22 = arith.cmpi ne, %21, %c0_i32_15 : i32
    scf.if %22 {
      %c0_16 = arith.constant 0 : index
      %c0_17 = arith.constant 0 : index
      %23 = vector.load %arg8[%c0_16, %c0_17] : memref<16x256xf32, #tpu.memory_space<vmem>>, vector<16x256xf32>
      %c0_18 = arith.constant 0 : index
      %c0_19 = arith.constant 0 : index
      %24 = vector.load %arg6[%c0_18, %c0_19] : memref<1x256xf32, #tpu.memory_space<vmem>>, vector<1x256xf32>
      %25 = vector.broadcast %24 : vector<1x256xf32> to vector<16x256xf32>
      %26 = arith.addf %23, %25 : vector<16x256xf32>
      %c0_20 = arith.constant 0 : index
      %c0_21 = arith.constant 0 : index
      %27 = vector.load %arg7[%c0_20, %c0_21] : memref<16x256xf32, #tpu.memory_space<vmem>>, vector<16x256xf32>
      tpu.vector_store %arg7[%c0_20, %c0_21], %26 {strides = array<i32>} : memref<16x256xf32, #tpu.memory_space<vmem>>, vector<16x256xf32>,
    } else {
    }
    return
  }
  func.func @transform_0(%arg0: i32, %arg1: i32) -> (i32, i32) {
    %c0_i32 = arith.constant 0 : i32
    %c0_i32_0 = arith.constant 0 : i32
    return %arg0, %c0_i32 : i32, i32
  }
  func.func @transform_1(%arg0: i32, %arg1: i32) -> (i32, i32) {
    %c0_i32 = arith.constant 0 : i32
    %c0_i32_0 = arith.constant 0 : i32
    return %c0_i32, %arg1 : i32, i32
  }
  func.func @transform_2(%arg0: i32, %arg1: i32) -> (i32, i32) {
    %c0_i32 = arith.constant 0 : i32
    %c0_i32_0 = arith.constant 0 : i32
    return %c0_i32, %arg1 : i32, i32
  }
  func.func @transform_3(%arg0: i32, %arg1: i32) -> (i32, i32) {
    %c0_i32 = arith.constant 0 : i32
    %c0_i32_0 = arith.constant 0 : i32
    return %arg1, %c0_i32 : i32, i32
  }
  func.func @transform_4(%arg0: i32, %arg1: i32) -> (i32, i32) {
    %c0_i32 = arith.constant 0 : i32
    %c0_i32_0 = arith.constant 0 : i32
    %c0_i32_1 = arith.constant 0 : i32
    return %c0_i32, %c0_i32_0 : i32, i32
  }
  func.func @transform_5(%arg0: i32, %arg1: i32) -> (i32, i32) {
    %c0_i32 = arith.constant 0 : i32
    %c0_i32_0 = arith.constant 0 : i32
    return %arg0, %c0_i32 : i32, i32
  }
}

</mosaic_0001>

<bundles_post_ra>
// kernel: feed_forward.1
= control target key start
LH: loop header
LB: loop body
LE: loop exit
PB: predicated region body
PF: predicated region fallthrough
CT: control target
= control target key end

     0   :  { %s951_s1 = inlined_call_operand.vmem [shape: f32[256,256], index: 1, kind: input, shape index: {}]   ;;  %s952_s0 = inlined_call_operand.vmem [shape: f32[16,256], index: 0, kind: input, shape index: {}]   ;;  %s953_s3 = inlined_call_operand.vmem [shape: f32[256,256], index: 3, kind: input, shape index: {}]   ;;  %s954_s2 = inlined_call_operand.vmem [shape: f32[1,256], index: 2, kind: input, shape index: {}]   ;;  %s955_s4 = inlined_call_operand.vmem [shape: f32[1,256], index: 4, kind: input, shape index: {}]   ;;  %s956_s5 = inlined_call_operand.vmem [shape: f32[16,256], index: 5, kind: output, shape index: {}]  }
   0x1   :  { %v62_v0 = vld [vmem:[%s951_s1 + $0xf0] sm:$0xff]  ;;  %v63_v1 = vld [vmem:[%s951_s1 + $0xf8] sm:$0xff]  ;;  %v60_v2 = vld [vmem:[%s951_s1 + $0xe0] sm:$0xff] }
   0x2   :  { %102 = vmatpush.msra.mxu0 %v62_v0  ;;  %148 = vmatpush.msra.mxu2 %v63_v1  ;;  %v94_v3 = vld [vmem:[%s951_s1 + $0x1f0] sm:$0xff]  ;;  %v61_v4 = vld [vmem:[%s951_s1 + $0xe8] sm:$0xff]  ;;  %v95_v5 = vld [vmem:[%s951_s1 + $0x1f8] sm:$0xff] }
   0x3   :  { %125 = vmatpush.msra.mxu1 %v94_v3  ;;  %171 = vmatpush.msra.mxu3 %v95_v5  ;;  %v58_v6 = vld [vmem:[%s951_s1 + $0xd0] sm:$0xff]  ;;  %v92_v7 = vld [vmem:[%s951_s1 + $0x1e0] sm:$0xff]  ;;  %v59_v8 = vld [vmem:[%s951_s1 + $0xd8] sm:$0xff] }
   0x4   :  { %103 = vmatpush.msra.mxu0 %v60_v2  ;;  %149 = vmatpush.msra.mxu2 %v61_v4  ;;  %v93_v9 = vld [vmem:[%s951_s1 + $0x1e8] sm:$0xff]  ;;  %v90_v10 = vld [vmem:[%s951_s1 + $0x1d0] sm:$0xff]  ;;  %v56_v11 = vld [vmem:[%s951_s1 + $0xc0] sm:$0xff] }
   0x5   :  { %126 = vmatpush.msra.mxu1 %v92_v7  ;;  %172 = vmatpush.msra.mxu3 %v93_v9  ;;  %v57_v12 = vld [vmem:[%s951_s1 + $0xc8] sm:$0xff]  ;;  %v91_v13 = vld [vmem:[%s951_s1 + $0x1d8] sm:$0xff]  ;;  %v88_v14 = vld [vmem:[%s951_s1 + $0x1c0] sm:$0xff] }
   0x6   :  { %104 = vmatpush.msra.mxu0 %v58_v6  ;;  %150 = vmatpush.msra.mxu2 %v59_v8  ;;  %v89_v15 = vld [vmem:[%s951_s1 + $0x1c8] sm:$0xff]  ;;  %v54_v16 = vld [vmem:[%s951_s1 + $0xb0] sm:$0xff]  ;;  %v55_v17 = vld [vmem:[%s951_s1 + $0xb8] sm:$0xff] }
   0x7   :  { %127 = vmatpush.msra.mxu1 %v90_v10  ;;  %173 = vmatpush.msra.mxu3 %v91_v13  ;;  %v86_v18 = vld [vmem:[%s951_s1 + $0x1b0] sm:$0xff]  ;;  %v87_v19 = vld [vmem:[%s951_s1 + $0x1b8] sm:$0xff]  ;;  %v52_v20 = vld [vmem:[%s951_s1 + $0xa0] sm:$0xff] }
   0x8   :  { %105 = vmatpush.msra.mxu0 %v56_v11  ;;  %151 = vmatpush.msra.mxu2 %v57_v12  ;;  %v53_v21 = vld [vmem:[%s951_s1 + $0xa8] sm:$0xff]  ;;  %v84_v22 = vld [vmem:[%s951_s1 + $0x1a0] sm:$0xff]  ;;  %v50_v24 = vld [vmem:[%s951_s1 + $0x90] sm:$0xff] }
   0x9   :  { %128 = vmatpush.msra.mxu1 %v88_v14  ;;  %174 = vmatpush.msra.mxu3 %v89_v15  ;;  %v85_v23 = vld [vmem:[%s951_s1 + $0x1a8] sm:$0xff]  ;;  %v51_v25 = vld [vmem:[%s951_s1 + $0x98] sm:$0xff]  ;;  %v82_v26 = vld [vmem:[%s951_s1 + $0x190] sm:$0xff] }
   0xa   :  { %106 = vmatpush.msra.mxu0 %v54_v16  ;;  %152 = vmatpush.msra.mxu2 %v55_v17  ;;  %v83_v27 = vld [vmem:[%s951_s1 + $0x198] sm:$0xff]  ;;  %v48_v28 = vld [vmem:[%s951_s1 + $0x80] sm:$0xff]  ;;  %v49_v29 = vld [vmem:[%s951_s1 + $0x88] sm:$0xff] }
   0xb   :  { %129 = vmatpush.msra.mxu1 %v86_v18  ;;  %175 = vmatpush.msra.mxu3 %v87_v19  ;;  %v80_v30 = vld [vmem:[%s951_s1 + $0x180] sm:$0xff]  ;;  %v81_v31 = vld [vmem:[%s951_s1 + $0x188] sm:$0xff]  ;;  %v46_v32 = vld [vmem:[%s951_s1 + $0x70] sm:$0xff] }
   0xc   :  { %107 = vmatpush.msra.mxu0 %v52_v20  ;;  %153 = vmatpush.msra.mxu2 %v53_v21  ;;  %v47_v33 = vld [vmem:[%s951_s1 + $0x78] sm:$0xff]  ;;  %v78_v34 = vld [vmem:[%s951_s1 + $0x170] sm:$0xff]  ;;  %v44_v36 = vld [vmem:[%s951_s1 + $0x60] sm:$0xff] }
   0xd   :  { %130 = vmatpush.msra.mxu1 %v84_v22  ;;  %176 = vmatpush.msra.mxu3 %v85_v23  ;;  %v79_v35 = vld [vmem:[%s951_s1 + $0x178] sm:$0xff]  ;;  %v45_v37 = vld [vmem:[%s951_s1 + $0x68] sm:$0xff]  ;;  %v76_v38 = vld [vmem:[%s951_s1 + $0x160] sm:$0xff] }
   0xe   :  { %108 = vmatpush.msra.mxu0 %v50_v24  ;;  %154 = vmatpush.msra.mxu2 %v51_v25  ;;  %v77_v39 = vld [vmem:[%s951_s1 + $0x168] sm:$0xff]  ;;  %v42_v40 = vld [vmem:[%s951_s1 + $0x50] sm:$0xff]  ;;  %v43_v41 = vld [vmem:[%s951_s1 + $0x58] sm:$0xff] }
   0xf   :  { %131 = vmatpush.msra.mxu1 %v82_v26  ;;  %177 = vmatpush.msra.mxu3 %v83_v27  ;;  %v74_v42 = vld [vmem:[%s951_s1 + $0x150] sm:$0xff]  ;;  %v75_v43 = vld [vmem:[%s951_s1 + $0x158] sm:$0xff]  ;;  %v40_v44 = vld [vmem:[%s951_s1 + $0x40] sm:$0xff] }
  0x10   :  { %109 = vmatpush.msra.mxu0 %v48_v28  ;;  %155 = vmatpush.msra.mxu2 %v49_v29  ;;  %v41_v45 = vld [vmem:[%s951_s1 + $0x48] sm:$0xff]  ;;  %v72_v46 = vld [vmem:[%s951_s1 + $0x140] sm:$0xff]  ;;  %v38_v48 = vld [vmem:[%s951_s1 + $0x30] sm:$0xff] }
  0x11   :  { %132 = vmatpush.msra.mxu1 %v80_v30  ;;  %178 = vmatpush.msra.mxu3 %v81_v31  ;;  %v73_v47 = vld [vmem:[%s951_s1 + $0x148] sm:$0xff]  ;;  %v39_v49 = vld [vmem:[%s951_s1 + $0x38] sm:$0xff]  ;;  %v70_v50 = vld [vmem:[%s951_s1 + $0x130] sm:$0xff] }
  0x12   :  { %110 = vmatpush.msra.mxu0 %v46_v32  ;;  %156 = vmatpush.msra.mxu2 %v47_v33  ;;  %v71_v51 = vld [vmem:[%s951_s1 + $0x138] sm:$0xff]  ;;  %v36_v52 = vld [vmem:[%s951_s1 + $0x20] sm:$0xff]  ;;  %v37_v53 = vld [vmem:[%s951_s1 + $0x28] sm:$0xff] }
  0x13   :  { %133 = vmatpush.msra.mxu1 %v78_v34  ;;  %179 = vmatpush.msra.mxu3 %v79_v35  ;;  %v68_v54 = vld [vmem:[%s951_s1 + $0x120] sm:$0xff]  ;;  %v69_v55 = vld [vmem:[%s951_s1 + $0x128] sm:$0xff]  ;;  %v34_v56 = vld [vmem:[%s951_s1 + $0x10] sm:$0xff] }
  0x14   :  { %111 = vmatpush.msra.mxu0 %v44_v36  ;;  %157 = vmatpush.msra.mxu2 %v45_v37  ;;  %v35_v57 = vld [vmem:[%s951_s1 + $0x18] sm:$0xff]  ;;  %v66_v58 = vld [vmem:[%s951_s1 + $0x110] sm:$0xff]  ;;  %v32_v60 = vld [vmem:[%s951_s1] sm:$0xff] }
  0x15   :  { %134 = vmatpush.msra.mxu1 %v76_v38  ;;  %180 = vmatpush.msra.mxu3 %v77_v39  ;;  %v67_v59 = vld [vmem:[%s951_s1 + $0x118] sm:$0xff]  ;;  %v33_v61 = vld [vmem:[%s951_s1 + $0x8] sm:$0xff]  ;;  %v28_v62 = vld [vmem:[%s952_s0] sm:$0xff] }
  0x16   :  { %112 = vmatpush.msra.mxu0 %v42_v40  ;;  %158 = vmatpush.msra.mxu2 %v43_v41  ;;  %v64_v63 = vld [vmem:[%s951_s1 + $0x100] sm:$0xff]  ;;  %v65_v0 = vld [vmem:[%s951_s1 + $0x108] sm:$0xff]  ;;  %v30_v2 = vld [vmem:[%s952_s0 + $0x10] sm:$0xff] }
  0x17   :  { %135 = vmatpush.msra.mxu1 %v74_v42  ;;  %181 = vmatpush.msra.mxu3 %v75_v43  ;;  %v29_v1 = vld [vmem:[%s952_s0 + $0x8] sm:$0xff]  ;;  %v31_v3 = vld [vmem:[%s952_s0 + $0x18] sm:$0xff]  ;;  %v308_v4 = vld [vmem:[%s953_s3 + $0xf0] sm:$0xff] }
  0x18   :  { %113 = vmatpush.msra.mxu0 %v40_v44  ;;  %159 = vmatpush.msra.mxu2 %v41_v45  ;;  %v309_v5 = vld [vmem:[%s953_s3 + $0xf8] sm:$0xff]  ;;  %v306_v6 = vld [vmem:[%s953_s3 + $0xe0] sm:$0xff]  ;;  %v307_v7 = vld [vmem:[%s953_s3 + $0xe8] sm:$0xff] }
  0x19   :  { %136 = vmatpush.msra.mxu1 %v72_v46  ;;  %182 = vmatpush.msra.mxu3 %v73_v47  ;;  %v304_v8 = vld [vmem:[%s953_s3 + $0xd0] sm:$0xff]  ;;  %v305_v9 = vld [vmem:[%s953_s3 + $0xd8] sm:$0xff]  ;;  %v302_v10 = vld [vmem:[%s953_s3 + $0xc0] sm:$0xff] }
  0x1a   :  { %114 = vmatpush.msra.mxu0 %v38_v48  ;;  %160 = vmatpush.msra.mxu2 %v39_v49  ;;  %v340_v11 = vld [vmem:[%s953_s3 + $0x1f0] sm:$0xff]  ;;  %v303_v12 = vld [vmem:[%s953_s3 + $0xc8] sm:$0xff]  ;;  %v341_v13 = vld [vmem:[%s953_s3 + $0x1f8] sm:$0xff] }
  0x1b   :  { %137 = vmatpush.msra.mxu1 %v70_v50  ;;  %183 = vmatpush.msra.mxu3 %v71_v51  ;;  %v300_v14 = vld [vmem:[%s953_s3 + $0xb0] sm:$0xff]  ;;  %v338_v15 = vld [vmem:[%s953_s3 + $0x1e0] sm:$0xff]  ;;  %v301_v16 = vld [vmem:[%s953_s3 + $0xb8] sm:$0xff] }
  0x1c   :  { %115 = vmatpush.msra.mxu0 %v36_v52  ;;  %161 = vmatpush.msra.mxu2 %v37_v53  ;;  %v339_v17 = vld [vmem:[%s953_s3 + $0x1e8] sm:$0xff]  ;;  %v298_v18 = vld [vmem:[%s953_s3 + $0xa0] sm:$0xff]  ;;  %v336_v19 = vld [vmem:[%s953_s3 + $0x1d0] sm:$0xff] }
  0x1d   :  { %138 = vmatpush.msra.mxu1 %v68_v54  ;;  %184 = vmatpush.msra.mxu3 %v69_v55  ;;  %v299_v20 = vld [vmem:[%s953_s3 + $0xa8] sm:$0xff]  ;;  %v337_v21 = vld [vmem:[%s953_s3 + $0x1d8] sm:$0xff]  ;;  %v296_v22 = vld [vmem:[%s953_s3 + $0x90] sm:$0xff] }
  0x1e   :  { %116 = vmatpush.msra.mxu0 %v34_v56  ;;  %162 = vmatpush.msra.mxu2 %v35_v57  ;;  %v334_v23 = vld [vmem:[%s953_s3 + $0x1c0] sm:$0xff]  ;;  %v297_v24 = vld [vmem:[%s953_s3 + $0x98] sm:$0xff]  ;;  %v335_v25 = vld [vmem:[%s953_s3 + $0x1c8] sm:$0xff] }
  0x1f   :  { %139 = vmatpush.msra.mxu1 %v66_v58  ;;  %185 = vmatpush.msra.mxu3 %v67_v59  ;;  %v294_v26 = vld [vmem:[%s953_s3 + $0x80] sm:$0xff]  ;;  %v332_v27 = vld [vmem:[%s953_s3 + $0x1b0] sm:$0xff]  ;;  %v295_v28 = vld [vmem:[%s953_s3 + $0x88] sm:$0xff] }
  0x20   :  { %117 = vmatpush.msra.mxu0 %v32_v60  ;;  %163 = vmatpush.msra.mxu2 %v33_v61  ;;  %v333_v29 = vld [vmem:[%s953_s3 + $0x1b8] sm:$0xff]  ;;  %v292_v30 = vld [vmem:[%s953_s3 + $0x70] sm:$0xff]  ;;  %v330_v31 = vld [vmem:[%s953_s3 + $0x1a0] sm:$0xff] }
  0x21   :  { %118 = vmatmul.f32.vlgmr.msra.gmra.mxu0 %v28_v62  ;;  %164 = vmatmul.f32.vlgmr.msra.gmra.mxu2 %v28_v62  ;;  %v293_v32 = vld [vmem:[%s953_s3 + $0x78] sm:$0xff]  ;;  %v331_v33 = vld [vmem:[%s953_s3 + $0x1a8] sm:$0xff]  ;;  %v290_v34 = vld [vmem:[%s953_s3 + $0x60] sm:$0xff] }
  0x22   :  { %140 = vmatpush.msra.mxu1 %v64_v63  ;;  %186 = vmatpush.msra.mxu3 %v65_v0  ;;  %v328_v35 = vld [vmem:[%s953_s3 + $0x190] sm:$0xff]  ;;  %v291_v36 = vld [vmem:[%s953_s3 + $0x68] sm:$0xff]  ;;  %v329_v37 = vld [vmem:[%s953_s3 + $0x198] sm:$0xff] }
  0x23   :  { %141 = vmatmul.f32.vlgmr.msra.gmra.mxu1 %v29_v1  ;;  %187 = vmatmul.f32.vlgmr.msra.gmra.mxu3 %v29_v1  ;;  %v288_v38 = vld [vmem:[%s953_s3 + $0x50] sm:$0xff]  ;;  %v326_v39 = vld [vmem:[%s953_s3 + $0x180] sm:$0xff]  ;;  %v289_v40 = vld [vmem:[%s953_s3 + $0x58] sm:$0xff] }
  0x24   :  { %342 = vmatpush.msrb.mxu0 %v308_v4  ;;  %388 = vmatpush.msrb.mxu2 %v309_v5  ;;  %v835_v41 = vld [vmem:[%s954_s2] sm:$0x3]  ;;  %v327_v42 = vld [vmem:[%s953_s3 + $0x188] sm:$0xff]  ;;  %v324_v44 = vld [vmem:[%s953_s3 + $0x170] sm:$0xff] }
  0x25   :  { %365 = vmatpush.msrb.mxu1 %v340_v11  ;;  %411 = vmatpush.msrb.mxu3 %v341_v13  ;;  %v286_v43 = vld [vmem:[%s953_s3 + $0x40] sm:$0xff]  ;;  %v287_v45 = vld [vmem:[%s953_s3 + $0x48] sm:$0xff]  ;;  %v325_v46 = vld [vmem:[%s953_s3 + $0x178] sm:$0xff]  ;;  %v98_v50 = vperm.slane %v835_v41, 0 }
  0x26   :  { %343 = vmatpush.msrb.mxu0 %v306_v6  ;;  %389 = vmatpush.msrb.mxu2 %v307_v7  ;;  %v284_v47 = vld [vmem:[%s953_s3 + $0x30] sm:$0xff]  ;;  %v322_v48 = vld [vmem:[%s953_s3 + $0x160] sm:$0xff]  ;;  %v285_v49 = vld [vmem:[%s953_s3 + $0x38] sm:$0xff] }
  0x27   :  { %366 = vmatpush.msrb.mxu1 %v338_v15  ;;  %412 = vmatpush.msrb.mxu3 %v339_v17  ;;  %v323_v51 = vld [vmem:[%s953_s3 + $0x168] sm:$0xff]  ;;  %v282_v52 = vld [vmem:[%s953_s3 + $0x20] sm:$0xff]  ;;  %v320_v53 = vld [vmem:[%s953_s3 + $0x150] sm:$0xff] }
  0x28   :  { %344 = vmatpush.msrb.mxu0 %v304_v8  ;;  %390 = vmatpush.msrb.mxu2 %v305_v9  ;;  %v283_v54 = vld [vmem:[%s953_s3 + $0x28] sm:$0xff]  ;;  %v321_v55 = vld [vmem:[%s953_s3 + $0x158] sm:$0xff]  ;;  %v280_v57 = vld [vmem:[%s953_s3 + $0x10] sm:$0xff] }
  0x29   :  { %121 = vmatmul.f32.gmra.mxu0 %v30_v2  ;;  %167 = vmatmul.f32.gmra.mxu2 %v30_v2  ;;  %v318_v58 = vld [vmem:[%s953_s3 + $0x140] sm:$0xff]  ;;  %v281_v59 = vld [vmem:[%s953_s3 + $0x18] sm:$0xff]  ;;  %v319_v61 = vld [vmem:[%s953_s3 + $0x148] sm:$0xff] }
  0x2a   :  { %345 = vmatpush.msrb.mxu0 %v302_v10  ;;  %391 = vmatpush.msrb.mxu2 %v303_v12  ;;  %v278_v63 = vld [vmem:[%s953_s3] sm:$0xff]  ;;  %v316_v0 = vld [vmem:[%s953_s3 + $0x130] sm:$0xff]  ;;  %v279_v1 = vld [vmem:[%s953_s3 + $0x8] sm:$0xff] }
  0x2b   :  { %144 = vmatmul.f32.gmra.mxu1 %v31_v3  ;;  %190 = vmatmul.f32.gmra.mxu3 %v31_v3  ;;  %v99_v3 = vperm.slane %v835_v41, 1  ;;  %v317_v4 = vld [vmem:[%s953_s3 + $0x138] sm:$0xff]  ;;  %v314_v5 = vld [vmem:[%s953_s3 + $0x120] sm:$0xff]  ;;  %v315_v6 = vld [vmem:[%s953_s3 + $0x128] sm:$0xff] }
  0x2c   :  { %346 = vmatpush.msrb.mxu0 %v300_v14  ;;  %392 = vmatpush.msrb.mxu2 %v301_v16  ;;  %v312_v9 = vld [vmem:[%s953_s3 + $0x110] sm:$0xff]  ;;  %v313_v10 = vld [vmem:[%s953_s3 + $0x118] sm:$0xff]  ;;  %v310_v12 = vld [vmem:[%s953_s3 + $0x100] sm:$0xff] }
  0x2d   :  { %367 = vmatpush.msrb.mxu1 %v336_v19  ;;  %413 = vmatpush.msrb.mxu3 %v337_v21  ;;  %v311_v13 = vld [vmem:[%s953_s3 + $0x108] sm:$0xff] }
  0x2e   :  { %347 = vmatpush.msrb.mxu0 %v298_v18  ;;  %393 = vmatpush.msrb.mxu2 %v299_v20 }
  0x2f   :  { %368 = vmatpush.msrb.mxu1 %v334_v23  ;;  %414 = vmatpush.msrb.mxu3 %v335_v25 }
  0x30   :  { %348 = vmatpush.msrb.mxu0 %v296_v22  ;;  %394 = vmatpush.msrb.mxu2 %v297_v24 }
  0x31   :  { %369 = vmatpush.msrb.mxu1 %v332_v27  ;;  %415 = vmatpush.msrb.mxu3 %v333_v29 }
  0x32   :  { %349 = vmatpush.msrb.mxu0 %v294_v26  ;;  %395 = vmatpush.msrb.mxu2 %v295_v28 }
  0x33   :  { %370 = vmatpush.msrb.mxu1 %v330_v31  ;;  %416 = vmatpush.msrb.mxu3 %v331_v33 }
  0x34   :  { %350 = vmatpush.msrb.mxu0 %v292_v30  ;;  %396 = vmatpush.msrb.mxu2 %v293_v32 }
  0x35   :  { %371 = vmatpush.msrb.mxu1 %v328_v35  ;;  %417 = vmatpush.msrb.mxu3 %v329_v37 }
  0x36   :  { %351 = vmatpush.msrb.mxu0 %v290_v34  ;;  %397 = vmatpush.msrb.mxu2 %v291_v36 }
  0x37   :  { %372 = vmatpush.msrb.mxu1 %v326_v39  ;;  %418 = vmatpush.msrb.mxu3 %v327_v42 }
  0x38   :  { %352 = vmatpush.msrb.mxu0 %v288_v38  ;;  %398 = vmatpush.msrb.mxu2 %v289_v40 }
  0x39   :  { %373 = vmatpush.msrb.mxu1 %v324_v44  ;;  %419 = vmatpush.msrb.mxu3 %v325_v46 }
  0x3a   :  { %353 = vmatpush.msrb.mxu0 %v286_v43  ;;  %399 = vmatpush.msrb.mxu2 %v287_v45 }
  0x3b   :  { %374 = vmatpush.msrb.mxu1 %v322_v48  ;;  %420 = vmatpush.msrb.mxu3 %v323_v51 }
  0x3c   :  { %354 = vmatpush.msrb.mxu0 %v284_v47  ;;  %400 = vmatpush.msrb.mxu2 %v285_v49 }
  0x3d   :  { %375 = vmatpush.msrb.mxu1 %v320_v53  ;;  %421 = vmatpush.msrb.mxu3 %v321_v55 }
  0x3e   :  { %355 = vmatpush.msrb.mxu0 %v282_v52  ;;  %401 = vmatpush.msrb.mxu2 %v283_v54 }
  0x3f   :  { %376 = vmatpush.msrb.mxu1 %v318_v58  ;;  %422 = vmatpush.msrb.mxu3 %v319_v61 }
  0x40   :  { %356 = vmatpush.msrb.mxu0 %v280_v57  ;;  %402 = vmatpush.msrb.mxu2 %v281_v59 }
  0x41   :  { %377 = vmatpush.msrb.mxu1 %v316_v0  ;;  %423 = vmatpush.msrb.mxu3 %v317_v4 }
  0x42   :  { %357 = vmatpush.msrb.mxu0 %v278_v63  ;;  %403 = vmatpush.msrb.mxu2 %v279_v1 }
  0x43   :  { %378 = vmatpush.msrb.mxu1 %v314_v5  ;;  %424 = vmatpush.msrb.mxu3 %v315_v6 }
  0x45   :  { %379 = vmatpush.msrb.mxu1 %v312_v9  ;;  %425 = vmatpush.msrb.mxu3 %v313_v10 }
  0x47   :  { %380 = vmatpush.msrb.mxu1 %v310_v12  ;;  %426 = vmatpush.msrb.mxu3 %v311_v13 }
  0x9e   :  { %v119_v56 = vpop.f32.mrf.mxu0 }
  0x9f   :  { %v120_v60 = vadd.f32 %v119_v56, %v98_v50 }
  0xa0   :  { %v142_v62 = vpop.f32.mrf.mxu1 }
  0xa1   :  { %v898_v2 = vadd.f32 %v142_v62, %v120_v60 }
  0xa3   :  { %v467_v7 = vmul.f32 -1.442695, %v898_v2 }
  0xa4   :  { %v165_v8 = vpop.f32.mrf.mxu2 }
  0xa5   :  { %471 = vpow2.f32 %v467_v7  ;;  %v166_v11 = vadd.f32 %v165_v8, %v99_v3 }
  0xa6   :  { %v122_v14 = vpop.f32.mrf.mxu0  ;;  %v188_v15 = vpop.f32.mrf.mxu3 }
  0xa7   :  { %v123_v16 = vadd.f32 %v122_v14, %v98_v50  ;;  %v923_v17 = vadd.f32 %v188_v15, %v166_v11  ;;  %v449_v15 = vld [vmem:[%s955_s4] sm:$0x3] }
  0xa8   :  { %v145_v18 = vpop.f32.mrf.mxu1 }
  0xa9   :  { %v468_v19 = vmul.f32 -1.442695, %v923_v17  ;;  %v926_v20 = vadd.f32 %v145_v18, %v123_v16 }
  0xab   :  { %v472_v21 = vpop.eup %471  ;;  %473 = vpow2.f32 %v468_v19  ;;  %v469_v22 = vmul.f32 -1.442695, %v926_v20 }
  0xac   :  { %v206_v23 = vadd.f32 1.0, %v472_v21  ;;  %v168_v24 = vpop.f32.mrf.mxu2 }
  0xad   :  { %475 = vpow2.f32 %v469_v22  ;;  %v169_v25 = vadd.f32 %v168_v24, %v99_v3  ;;  %v452_v22 = vperm.slane %v449_v15, 1 }
  0xae   :  { %477 = vrcp.f32 %v206_v23  ;;  %v191_v26 = vpop.f32.mrf.mxu3  ;;  %v221_v36 = vand.u32 2147483648, %v206_v23  ;;  %vm215_vm0 = vweird.f32 %v206_v23  ;;  %v219_v39 = vand.u32 2147483647, %v206_v23 }
  0xaf   :  { %v929_v27 = vadd.f32 %v191_v26, %v169_v25 }
  0xb0   :  { %v222_v44 = vor.u32 1.1754944e-38, %v221_v36  ;;  %vm220_vm3 = vcmp.eq.f32.partialorder %v219_v39, 8.507059e+37 }
  0xb1   :  { %v474_v28 = vpop.eup %473  ;;  %v470_v29 = vmul.f32 -1.442695, %v929_v27 }
  0xb2   :  { %v207_v30 = vadd.f32 1.0, %v474_v28 }
  0xb3   :  { %v476_v31 = vpop.eup %475  ;;  %479 = vpow2.f32 %v470_v29 }
  0xb4   :  { %v478_v32 = vpop.eup %477  ;;  %481 = vrcp.f32 %v207_v30  ;;  %v208_v34 = vadd.f32 1.0, %v476_v31  ;;  %v236_v48 = vand.u32 2147483648, %v207_v30  ;;  %v234_v53 = vand.u32 2147483647, %v207_v30 }
  0xb5   :  { %v211_v33 = vmul.f32 %v478_v32, %v206_v23  ;;  %vm216_vm1 = vweird.f32 %v478_v32  ;;  %vm230_vm5 = vweird.f32 %v207_v30 }
  0xb6   :  { %483 = vrcp.f32 %v208_v34  ;;  %vm217_vm2 = vmor %vm215_vm0, %vm216_vm1  ;;  %v237_v56 = vor.u32 1.1754944e-38, %v236_v48  ;;  %v251_v57 = vand.u32 2147483648, %v208_v34  ;;  %vm245_vm7 = vweird.f32 %v208_v34 }
  0xb7   :  { %v212_v35 = vsub.f32 1.0, %v211_v33  ;;  %v249_v60 = vand.u32 2147483647, %v208_v34  ;;  %vm235_vm9 = vcmp.eq.f32.partialorder %v234_v53, 8.507059e+37 }
  0xb9   :  { %v480_v37 = vpop.eup %479  ;;  %v213_v38 = vmul.f32 %v478_v32, %v212_v35  ;;  %vm250_vm11 = vcmp.eq.f32.partialorder %v249_v60, 8.507059e+37 }
  0xba   :  { %v482_v40 = vpop.eup %481  ;;  %v209_v41 = vadd.f32 1.0, %v480_v37 }
  0xbb   :  { %v214_v42 = vadd.f32 %v478_v32, %v213_v38  ;;  %v226_v43 = vmul.f32 %v482_v40, %v207_v30  ;;  %vm231_vm4 = vweird.f32 %v482_v40 }
  0xbc   :  { %485 = vrcp.f32 %v209_v41  ;;  %v484_v45 = vpop.eup %483  ;;  %vm232_vm6 = vmor %vm230_vm5, %vm231_vm4  ;;  %v266_v5 = vand.u32 2147483648, %v209_v41  ;;  %v264_v8 = vand.u32 2147483647, %v209_v41  ;;  %vm260_vm13 = vweird.f32 %v209_v41 }
  0xbd   :  { %v218_v46 = vsel %vm217_vm2, %v478_v32, %v214_v42  ;;  %v227_v47 = vsub.f32 1.0, %v226_v43  ;;  %v241_v50 = vmul.f32 %v484_v45, %v208_v34  ;;  %vm246_vm8 = vweird.f32 %v484_v45 }
  0xbe   :  { %v223_v49 = vsel %vm220_vm3, %v222_v44, %v218_v46  ;;  %vm247_vm10 = vmor %vm245_vm7, %vm246_vm8  ;;  %v267_v11 = vor.u32 1.1754944e-38, %v266_v5  ;;  %vm265_vm15 = vcmp.eq.f32.partialorder %v264_v8, 8.507059e+37 }
  0xbf   :  { %v270_v51 = vmul.f32 %v223_v49, %v898_v2  ;;  %v228_v52 = vmul.f32 %v482_v40, %v227_v47  ;;  %v242_v54 = vsub.f32 1.0, %v241_v50  ;;  %v252_v2 = vor.u32 1.1754944e-38, %v251_v57 }
  0xc1   :  { %v229_v55 = vadd.f32 %v482_v40, %v228_v52  ;;  %358 = vmatmul.f32.vlgmr.msrb.gmra.mxu0 %v270_v51  ;;  %404 = vmatmul.f32.vlgmr.msrb.gmra.mxu2 %v270_v51  ;;  %v243_v59 = vmul.f32 %v484_v45, %v242_v54 }
  0xc2   :  { %v486_v58 = vpop.eup %485 }
  0xc3   :  { %v233_v61 = vsel %vm232_vm6, %v482_v40, %v229_v55  ;;  %v256_v62 = vmul.f32 %v486_v58, %v209_v41  ;;  %v244_v0 = vadd.f32 %v484_v45, %v243_v59  ;;  %vm261_vm12 = vweird.f32 %v486_v58 }
  0xc4   :  { %v238_v63 = vsel %vm235_vm9, %v237_v56, %v233_v61  ;;  %vm262_vm14 = vmor %vm260_vm13, %vm261_vm12 }
  0xc5   :  { %v271_v1 = vmul.f32 %v238_v63, %v923_v17  ;;  %v257_v3 = vsub.f32 1.0, %v256_v62  ;;  %v248_v4 = vsel %vm247_vm10, %v484_v45, %v244_v0  ;;  %v451_v17 = vperm.slane %v449_v15, 0 }
  0xc6   :  { %v253_v6 = vsel %vm250_vm11, %v252_v2, %v248_v4 }
  0xc7   :  { %381 = vmatmul.f32.vlgmr.msrb.gmra.mxu1 %v271_v1  ;;  %427 = vmatmul.f32.vlgmr.msrb.gmra.mxu3 %v271_v1  ;;  %v258_v7 = vmul.f32 %v486_v58, %v257_v3  ;;  %v272_v9 = vmul.f32 %v253_v6, %v926_v20 }
  0xc9   :  { %v259_v10 = vadd.f32 %v486_v58, %v258_v7  ;;  %361 = vmatmul.f32.gmra.mxu0 %v272_v9  ;;  %407 = vmatmul.f32.gmra.mxu2 %v272_v9 }
  0xcb   :  { %v263_v12 = vsel %vm262_vm14, %v486_v58, %v259_v10 }
  0xcc   :  { %v268_v13 = vsel %vm265_vm15, %v267_v11, %v263_v12 }
  0xcd   :  { %v273_v14 = vmul.f32 %v268_v13, %v929_v27 }
  0xcf   :  { %384 = vmatmul.f32.gmra.mxu1 %v273_v14  ;;  %430 = vmatmul.f32.gmra.mxu3 %v273_v14 }
 0x13e   :  { %v359_v16 = vpop.f32.mrf.mxu0 }
 0x144   :  { %v382_v18 = vpop.f32.mrf.mxu1  ;;  %v405_v21 = vpop.f32.mrf.mxu2 }
 0x145   :  { %v383_v19 = vadd.f32 %v382_v18, %v359_v16 }
 0x146   :  { %v362_v25 = vpop.f32.mrf.mxu0 }
 0x147   :  { %v455_v20 = vadd.f32 %v451_v17, %v383_v19 }
 0x149   :  { %459 = vst [vmem:[%s956_s5] sm:$0xff] %v455_v20 }
 0x14a   :  { %v428_v23 = vpop.f32.mrf.mxu3 }
 0x14b   :  { %v429_v24 = vadd.f32 %v428_v23, %v405_v21 }
 0x14c   :  { %v385_v26 = vpop.f32.mrf.mxu1  ;;  %v408_v30 = vpop.f32.mrf.mxu2 }
 0x14d   :  { %v456_v27 = vadd.f32 %v452_v22, %v429_v24  ;;  %v386_v28 = vadd.f32 %v385_v26, %v362_v25 }
 0x14f   :  { %460 = vst [vmem:[%s956_s5 + $0x8] sm:$0xff] %v456_v27  ;;  %v457_v29 = vadd.f32 %v451_v17, %v386_v28 }
 0x151   :  { %461 = vst [vmem:[%s956_s5 + $0x10] sm:$0xff] %v457_v29 }
 0x152   :  { %v431_v31 = vpop.f32.mrf.mxu3 }
 0x153   :  { %v432_v32 = vadd.f32 %v431_v31, %v408_v30 }
 0x155   :  { %v458_v33 = vadd.f32 %v452_v22, %v432_v32 }
 0x157   :  { %462 = vst [vmem:[%s956_s5 + $0x18] sm:$0xff] %v458_v33 }

</bundles_post_ra>
